<compile_context>
chip_gen: v5e
topology: v5e:2x2
jax: 0.10.0
libtpu: 0.0.40
codegen_flags: <defaults>
</compile_context>

<pallas_src>
import functools

import jax
import jax.numpy as jnp
from jax.experimental import pallas as pl
from jax.experimental.pallas import tpu as pltpu

X_RANGE = (-1.0, 1.0)


def _round_up(n, m):
    return (n + m - 1) // m * m


def _make_knots(n_cps, k):
    """Uniform knot vector: G = n_cps - k interior intervals, extended by k each side."""
    g = n_cps - k
    h = (X_RANGE[1] - X_RANGE[0]) / g
    return [X_RANGE[0] + (i - k) * h for i in range(g + 2 * k + 1)]


def _bspline_basis(x, n_cps, k):
    """Cox-de Boor recursion, fully unrolled (n_cps, k are static).

    x: float array of any shape.  Returns a list of n_cps arrays shaped like x.
    All knot-difference reciprocals are Python constants (no runtime divides).
    """
    t = _make_knots(n_cps, k)
    n0 = len(t) - 1  # number of degree-0 basis functions
    bases = []
    for c in range(n0):
        lo, hi = t[c], t[c + 1]
        if abs(hi - X_RANGE[1]) < 1e-9:
            # Include the right domain endpoint in the last in-domain interval
            # (standard B-spline convention; avoids a dead spline at x == 1.0).
            ind = (x >= lo) & (x <= hi)
        else:
            ind = (x >= lo) & (x < hi)
        bases.append(ind.astype(x.dtype))
    # NOTE: degree-0 bases over the k extension intervals are kept so that
    # out-of-range inputs retain the "zero spline contribution" behavior.
    for p in range(1, k + 1):
        nxt = []
        for c in range(n0 - p):
            inv_l = 1.0 / (t[c + p] - t[c])
            inv_r = 1.0 / (t[c + p + 1] - t[c + 1])
            nxt.append((x - t[c]) * inv_l * bases[c]
                       + (t[c + p + 1] - x) * inv_r * bases[c + 1])
        bases = nxt
    assert len(bases) == n_cps
    return bases


def _kan_kernel(xt_ref, w0c_ref, w1t_ref, ot_ref, *, n_cps, k):
    # xt: (inDim, TB) f32 -- batch lives on the 128-lane axis.
    xt = xt_ref[...]

    # SiLU residual branch: exp + approx reciprocal both issue on the EUP slot,
    # leaving the VPU slots to the basis recursion below.
    silu = xt * pl.reciprocal(1.0 + jnp.exp(-xt), approx=True)
    acc = jnp.dot(w1t_ref[...], silu.astype(jnp.bfloat16),
                  preferred_element_type=jnp.float32)              # (outDim, TB)

    # Spline branch: one small MXU dot per control point, accumulated in f32.
    # (No lane-axis concatenate, no materialized flat-basis buffer.)
    bases = _bspline_basis(xt, n_cps, k)                           # n_cps x (inDim, TB)
    for c in range(n_cps):
        acc = acc + jnp.dot(w0c_ref[c], bases[c].astype(jnp.bfloat16),
                            preferred_element_type=jnp.float32)

    ot_ref[...] = acc.astype(ot_ref.dtype)


def kan_layer(x, cps, w, *, k=3, batch_tile=512, interpret=False):
    """Pallas-backed KANLayer forward.

    x:   (batch, inDim) float32
    cps: (inDim, outDim, nCps) float32
    w:   (2, inDim, outDim, 1) float32
    returns (batch, outDim) float32
    """
    in_dim, out_dim, n_cps = cps.shape
    batch = x.shape[0]

    # Fold w[0] into the control points and lay both weights out transposed for
    # the batch-in-lanes kernel.  bf16 at the matmul boundary (f32 accumulate).
    w0c = jnp.transpose(w[0] * cps, (2, 1, 0)).astype(jnp.bfloat16)  # (nCps, outDim, inDim)
    w1t = jnp.transpose(w[1][..., 0]).astype(jnp.bfloat16)           # (outDim, inDim)

    # Batch tiling: batch is the lane axis; pad so every block is lane-dense
    # (multiple of 128) and the tile evenly divides the padded batch.
    if batch <= batch_tile:
        tb = _round_up(batch, 128)
        b_pad = tb
    else:
        tb = batch_tile
        b_pad = _round_up(batch, tb)
    xt = jnp.pad(jnp.transpose(x), ((0, 0), (0, b_pad - batch)))     # (inDim, b_pad)

    kernel = functools.partial(_kan_kernel, n_cps=n_cps, k=k)
    yt = pl.pallas_call(
        kernel,
        out_shape=jax.ShapeDtypeStruct((out_dim, b_pad), x.dtype),
        grid=(b_pad // tb,),
        in_specs=[
            pl.BlockSpec((in_dim, tb), lambda i: (0, i)),
            # Weights: full block, constant index_map -> stay resident in VMEM.
            pl.BlockSpec((n_cps, out_dim, in_dim), lambda i: (0, 0, 0)),
            pl.BlockSpec((out_dim, in_dim), lambda i: (0, 0)),
        ],
        out_specs=pl.BlockSpec((out_dim, tb), lambda i: (0, i)),
        compiler_params=pltpu.CompilerParams(
            # Independent batch tiles: shard across the two TensorCores on v7x.
            dimension_semantics=("parallel",),
            # 32 MiB scoped VMEM: raises v5e's 16 MiB default, matches the
            # v6e/v7x default, and stays well inside v7x's 64 MiB physical VMEM
            # (per-step buffers here are < 1 MiB at the default tile).
            vmem_limit_bytes=32 * 1024 * 1024,
        ),
        interpret=interpret,
    )(xt, w0c, w1t)

    # Layout plumbing back to the module's (batch, outDim) convention.
    return jnp.transpose(yt)[:batch]


def kan_ref(x, cps, w, *, k=3):
    """Pure-JAX f32 reference of the same math (for the self-check)."""
    in_dim, out_dim, n_cps = cps.shape
    basis = jnp.stack(_bspline_basis(x, n_cps, k), axis=-1)          # (B, inDim, nCps)
    spline = jnp.einsum("bdc,doc->bdo", basis, cps)                  # (B, inDim, outDim)
    silu_x = x * jax.nn.sigmoid(x)                                   # (B, inDim)
    y = (w[0][..., 0][None] * spline
         + w[1][..., 0][None] * silu_x[..., None]).sum(axis=-2)      # (B, outDim)
    return y


if __name__ == "__main__":
    key = jax.random.PRNGKey(0)
    key1, key2 = jax.random.split(key)

    def make_inputs(kk, batch, in_dim, out_dim, n_cps):
        kx, kc, kw = jax.random.split(kk, 3)
        x = jax.random.uniform(kx, (batch, in_dim), jnp.float32, minval=-0.9, maxval=0.9)
        cps = 0.1 * jax.random.normal(kc, (in_dim, out_dim, n_cps), jnp.float32)
        w = jax.random.normal(kw, (2, in_dim, out_dim, 1), jnp.float32) * (
            2.0 / (in_dim * out_dim)) ** 0.5
        return x, cps, w

    # bf16 matmul operands + approximate EUP reciprocal in SiLU give ~1e-3-level
    # differences vs the f32 reference -> loosened tolerances (per review note).
    RTOL, ATOL = 2e-2, 1e-2
    k, n_cps = 3, 6

    # Small shapes consistent with the module: batch=8, inDim=4, outDim=16.
    x, cps, w = make_inputs(key1, 8, 4, 16, n_cps)
    y = jax.block_until_ready(kan_layer(x, cps, w, k=k))
    y_ref = kan_ref(x, cps, w, k=k)
    assert y.shape == (8, 16)
    assert jnp.allclose(y, y_ref, rtol=RTOL, atol=ATOL), (
        f"mismatch vs ref, max abs err {jnp.max(jnp.abs(y - y_ref))}")

    # Second check exercising multi-tile batch pipelining + lane padding.
    x2, cps2, w2 = make_inputs(key2, 1031, 4, 16, n_cps)
    y2 = jax.block_until_ready(kan_layer(x2, cps2, w2, k=k))
    y2_ref = kan_ref(x2, cps2, w2, k=k)
    assert y2.shape == (1031, 16)
    assert jnp.allclose(y2, y2_ref, rtol=RTOL, atol=ATOL), (
        f"mismatch vs ref (tiled), max abs err {jnp.max(jnp.abs(y2 - y2_ref))}")

    # TODO(synk): updateCps (torch.linalg.lstsq based grid refinement) is a
    # training-time utility, not part of the forward pass; not ported.
    print("KERNEL_OK")
</pallas_src>

<mosaic_0001>
module attributes {stable_mosaic.version = 11 : i64} {
  func.func @_kan_kernel(%arg0: i32, %arg1: memref<4x128xf32, #tpu.memory_space<vmem>>, %arg2: memref<6x16x4xbf16, #tpu.memory_space<vmem>>, %arg3: memref<16x4xbf16, #tpu.memory_space<vmem>>, %arg4: memref<16x128xf32, #tpu.memory_space<vmem>>) attributes {dimension_semantics = [#tpu.dimension_semantics<parallel>], iteration_bounds = array<i64: 1>, scalar_prefetch = 0 : i64, scratch_operands = 0 : i64, tpu.core_type = #tpu.core_type<tc>, window_params = [{transform_indices = @transform_0, window_bounds = array<i64: 4, 128>}, {pipeline_mode = #tpu.pipeline_mode<synchronous>, transform_indices = @transform_1, window_bounds = array<i64: 6, 16, 4>}, {pipeline_mode = #tpu.pipeline_mode<synchronous>, transform_indices = @transform_2, window_bounds = array<i64: 16, 4>}, {transform_indices = @transform_3, window_bounds = array<i64: 16, 128>}]} {
    %c0 = arith.constant 0 : index
    %c0_0 = arith.constant 0 : index
    %0 = vector.load %arg1[%c0, %c0_0] : memref<4x128xf32, #tpu.memory_space<vmem>>, vector<4x128xf32>
    %cst = arith.constant 0.000000e+00 : f32
    %1 = vector.broadcast %cst : f32 to vector<4x128xf32>
    %2 = arith.subf %1, %0 : vector<4x128xf32>
    %3 = math.exp %2 : vector<4x128xf32>
    %cst_1 = arith.constant 1.000000e+00 : f32
    %4 = vector.broadcast %cst_1 : f32 to vector<4x128xf32>
    %5 = arith.addf %4, %3 : vector<4x128xf32>
    %6 = tpu.reciprocal %5 {approx = true} : vector<4x128xf32> -> vector<4x128xf32>
    %7 = arith.mulf %0, %6 : vector<4x128xf32>
    %c0_2 = arith.constant 0 : index
    %c0_3 = arith.constant 0 : index
    %8 = vector.load %arg3[%c0_2, %c0_3] : memref<16x4xbf16, #tpu.memory_space<vmem>>, vector<16x4xbf16>
    %9 = arith.truncf %7 : vector<4x128xf32> to vector<4x128xbf16>
    %cst_4 = arith.constant dense<0.000000e+00> : vector<16x128xf32>
    %10 = tpu.matmul %8, %9, %cst_4 {dimension_numbers = #tpu.dot_dimension_numbers<[1], [0], [0], [1], [0, 0, 1, 1], [], []>} : vector<16x4xbf16>, vector<4x128xbf16>, vector<16x128xf32> -> vector<16x128xf32>
    %cst_5 = arith.constant -3.000000e+00 : f32
    %11 = vector.broadcast %cst_5 : f32 to vector<4x128xf32>
    %12 = arith.cmpf oge, %0, %11 : vector<4x128xf32>
    %cst_6 = arith.constant -2.33333325 : f32
    %13 = vector.broadcast %cst_6 : f32 to vector<4x128xf32>
    %14 = arith.cmpf olt, %0, %13 : vector<4x128xf32>
    %15 = arith.andi %12, %14 : vector<4x128xi1>
    %16 = arith.extui %15 : vector<4x128xi1> to vector<4x128xi32>
    %17 = arith.sitofp %16 : vector<4x128xi32> to vector<4x128xf32>
    %cst_7 = arith.constant -2.33333325 : f32
    %18 = vector.broadcast %cst_7 : f32 to vector<4x128xf32>
    %19 = arith.cmpf oge, %0, %18 : vector<4x128xf32>
    %cst_8 = arith.constant -1.66666663 : f32
    %20 = vector.broadcast %cst_8 : f32 to vector<4x128xf32>
    %21 = arith.cmpf olt, %0, %20 : vector<4x128xf32>
    %22 = arith.andi %19, %21 : vector<4x128xi1>
    %23 = arith.extui %22 : vector<4x128xi1> to vector<4x128xi32>
    %24 = arith.sitofp %23 : vector<4x128xi32> to vector<4x128xf32>
    %cst_9 = arith.constant -1.66666663 : f32
    %25 = vector.broadcast %cst_9 : f32 to vector<4x128xf32>
    %26 = arith.cmpf oge, %0, %25 : vector<4x128xf32>
    %cst_10 = arith.constant -1.000000e+00 : f32
    %27 = vector.broadcast %cst_10 : f32 to vector<4x128xf32>
    %28 = arith.cmpf olt, %0, %27 : vector<4x128xf32>
    %29 = arith.andi %26, %28 : vector<4x128xi1>
    %30 = arith.extui %29 : vector<4x128xi1> to vector<4x128xi32>
    %31 = arith.sitofp %30 : vector<4x128xi32> to vector<4x128xf32>
    %cst_11 = arith.constant -1.000000e+00 : f32
    %32 = vector.broadcast %cst_11 : f32 to vector<4x128xf32>
    %33 = arith.cmpf oge, %0, %32 : vector<4x128xf32>
    %cst_12 = arith.constant -0.333333343 : f32
    %34 = vector.broadcast %cst_12 : f32 to vector<4x128xf32>
    %35 = arith.cmpf olt, %0, %34 : vector<4x128xf32>
    %36 = arith.andi %33, %35 : vector<4x128xi1>
    %37 = arith.extui %36 : vector<4x128xi1> to vector<4x128xi32>
    %38 = arith.sitofp %37 : vector<4x128xi32> to vector<4x128xf32>
    %cst_13 = arith.constant -0.333333343 : f32
    %39 = vector.broadcast %cst_13 : f32 to vector<4x128xf32>
    %40 = arith.cmpf oge, %0, %39 : vector<4x128xf32>
    %cst_14 = arith.constant 0.333333343 : f32
    %41 = vector.broadcast %cst_14 : f32 to vector<4x128xf32>
    %42 = arith.cmpf olt, %0, %41 : vector<4x128xf32>
    %43 = arith.andi %40, %42 : vector<4x128xi1>
    %44 = arith.extui %43 : vector<4x128xi1> to vector<4x128xi32>
    %45 = arith.sitofp %44 : vector<4x128xi32> to vector<4x128xf32>
    %cst_15 = arith.constant 0.333333343 : f32
    %46 = vector.broadcast %cst_15 : f32 to vector<4x128xf32>
    %47 = arith.cmpf oge, %0, %46 : vector<4x128xf32>
    %cst_16 = arith.constant 1.000000e+00 : f32
    %48 = vector.broadcast %cst_16 : f32 to vector<4x128xf32>
    %49 = arith.cmpf ole, %0, %48 : vector<4x128xf32>
    %50 = arith.andi %47, %49 : vector<4x128xi1>
    %51 = arith.extui %50 : vector<4x128xi1> to vector<4x128xi32>
    %52 = arith.sitofp %51 : vector<4x128xi32> to vector<4x128xf32>
    %cst_17 = arith.constant 1.000000e+00 : f32
    %53 = vector.broadcast %cst_17 : f32 to vector<4x128xf32>
    %54 = arith.cmpf oge, %0, %53 : vector<4x128xf32>
    %cst_18 = arith.constant 1.66666663 : f32
    %55 = vector.broadcast %cst_18 : f32 to vector<4x128xf32>
    %56 = arith.cmpf olt, %0, %55 : vector<4x128xf32>
    %57 = arith.andi %54, %56 : vector<4x128xi1>
    %58 = arith.extui %57 : vector<4x128xi1> to vector<4x128xi32>
    %59 = arith.sitofp %58 : vector<4x128xi32> to vector<4x128xf32>
    %cst_19 = arith.constant 1.66666663 : f32
    %60 = vector.broadcast %cst_19 : f32 to vector<4x128xf32>
    %61 = arith.cmpf oge, %0, %60 : vector<4x128xf32>
    %cst_20 = arith.constant 2.33333325 : f32
    %62 = vector.broadcast %cst_20 : f32 to vector<4x128xf32>
    %63 = arith.cmpf olt, %0, %62 : vector<4x128xf32>
    %64 = arith.andi %61, %63 : vector<4x128xi1>
    %65 = arith.extui %64 : vector<4x128xi1> to vector<4x128xi32>
    %66 = arith.sitofp %65 : vector<4x128xi32> to vector<4x128xf32>
    %cst_21 = arith.constant 2.33333325 : f32
    %67 = vector.broadcast %cst_21 : f32 to vector<4x128xf32>
    %68 = arith.cmpf oge, %0, %67 : vector<4x128xf32>
    %cst_22 = arith.constant 3.000000e+00 : f32
    %69 = vector.broadcast %cst_22 : f32 to vector<4x128xf32>
    %70 = arith.cmpf olt, %0, %69 : vector<4x128xf32>
    %71 = arith.andi %68, %70 : vector<4x128xi1>
    %72 = arith.extui %71 : vector<4x128xi1> to vector<4x128xi32>
    %73 = arith.sitofp %72 : vector<4x128xi32> to vector<4x128xf32>
    %cst_23 = arith.constant -3.000000e+00 : f32
    %74 = vector.broadcast %cst_23 : f32 to vector<4x128xf32>
    %75 = arith.subf %0, %74 : vector<4x128xf32>
    %cst_24 = arith.constant 1.500000e+00 : f32
    %76 = vector.broadcast %cst_24 : f32 to vector<4x128xf32>
    %77 = arith.mulf %75, %76 : vector<4x128xf32>
    %78 = arith.mulf %77, %17 : vector<4x128xf32>
    %cst_25 = arith.constant -1.66666663 : f32
    %79 = vector.broadcast %cst_25 : f32 to vector<4x128xf32>
    %80 = arith.subf %79, %0 : vector<4x128xf32>
    %cst_26 = arith.constant 1.500000e+00 : f32
    %81 = vector.broadcast %cst_26 : f32 to vector<4x128xf32>
    %82 = arith.mulf %80, %81 : vector<4x128xf32>
    %83 = arith.mulf %82, %24 : vector<4x128xf32>
    %84 = arith.addf %78, %83 : vector<4x128xf32>
    %cst_27 = arith.constant -2.33333325 : f32
    %85 = vector.broadcast %cst_27 : f32 to vector<4x128xf32>
    %86 = arith.subf %0, %85 : vector<4x128xf32>
    %cst_28 = arith.constant 1.500000e+00 : f32
    %87 = vector.broadcast %cst_28 : f32 to vector<4x128xf32>
    %88 = arith.mulf %86, %87 : vector<4x128xf32>
    %89 = arith.mulf %88, %24 : vector<4x128xf32>
    %cst_29 = arith.constant -1.000000e+00 : f32
    %90 = vector.broadcast %cst_29 : f32 to vector<4x128xf32>
    %91 = arith.subf %90, %0 : vector<4x128xf32>
    %cst_30 = arith.constant 1.500000e+00 : f32
    %92 = vector.broadcast %cst_30 : f32 to vector<4x128xf32>
    %93 = arith.mulf %91, %92 : vector<4x128xf32>
    %94 = arith.mulf %93, %31 : vector<4x128xf32>
    %95 = arith.addf %89, %94 : vector<4x128xf32>
    %cst_31 = arith.constant -1.66666663 : f32
    %96 = vector.broadcast %cst_31 : f32 to vector<4x128xf32>
    %97 = arith.subf %0, %96 : vector<4x128xf32>
    %cst_32 = arith.constant 1.500000e+00 : f32
    %98 = vector.broadcast %cst_32 : f32 to vector<4x128xf32>
    %99 = arith.mulf %97, %98 : vector<4x128xf32>
    %100 = arith.mulf %99, %31 : vector<4x128xf32>
    %cst_33 = arith.constant -0.333333343 : f32
    %101 = vector.broadcast %cst_33 : f32 to vector<4x128xf32>
    %102 = arith.subf %101, %0 : vector<4x128xf32>
    %cst_34 = arith.constant 1.500000e+00 : f32
    %103 = vector.broadcast %cst_34 : f32 to vector<4x128xf32>
    %104 = arith.mulf %102, %103 : vector<4x128xf32>
    %105 = arith.mulf %104, %38 : vector<4x128xf32>
    %106 = arith.addf %100, %105 : vector<4x128xf32>
    %cst_35 = arith.constant -1.000000e+00 : f32
    %107 = vector.broadcast %cst_35 : f32 to vector<4x128xf32>
    %108 = arith.subf %0, %107 : vector<4x128xf32>
    %cst_36 = arith.constant 1.500000e+00 : f32
    %109 = vector.broadcast %cst_36 : f32 to vector<4x128xf32>
    %110 = arith.mulf %108, %109 : vector<4x128xf32>
    %111 = arith.mulf %110, %38 : vector<4x128xf32>
    %cst_37 = arith.constant 0.333333343 : f32
    %112 = vector.broadcast %cst_37 : f32 to vector<4x128xf32>
    %113 = arith.subf %112, %0 : vector<4x128xf32>
    %cst_38 = arith.constant 1.500000e+00 : f32
    %114 = vector.broadcast %cst_38 : f32 to vector<4x128xf32>
    %115 = arith.mulf %113, %114 : vector<4x128xf32>
    %116 = arith.mulf %115, %45 : vector<4x128xf32>
    %117 = arith.addf %111, %116 : vector<4x128xf32>
    %cst_39 = arith.constant -0.333333343 : f32
    %118 = vector.broadcast %cst_39 : f32 to vector<4x128xf32>
    %119 = arith.subf %0, %118 : vector<4x128xf32>
    %cst_40 = arith.constant 1.500000e+00 : f32
    %120 = vector.broadcast %cst_40 : f32 to vector<4x128xf32>
    %121 = arith.mulf %119, %120 : vector<4x128xf32>
    %122 = arith.mulf %121, %45 : vector<4x128xf32>
    %cst_41 = arith.constant 1.000000e+00 : f32
    %123 = vector.broadcast %cst_41 : f32 to vector<4x128xf32>
    %124 = arith.subf %123, %0 : vector<4x128xf32>
    %cst_42 = arith.constant 1.500000e+00 : f32
    %125 = vector.broadcast %cst_42 : f32 to vector<4x128xf32>
    %126 = arith.mulf %124, %125 : vector<4x128xf32>
    %127 = arith.mulf %126, %52 : vector<4x128xf32>
    %128 = arith.addf %122, %127 : vector<4x128xf32>
    %cst_43 = arith.constant 0.333333343 : f32
    %129 = vector.broadcast %cst_43 : f32 to vector<4x128xf32>
    %130 = arith.subf %0, %129 : vector<4x128xf32>
    %cst_44 = arith.constant 1.500000e+00 : f32
    %131 = vector.broadcast %cst_44 : f32 to vector<4x128xf32>
    %132 = arith.mulf %130, %131 : vector<4x128xf32>
    %133 = arith.mulf %132, %52 : vector<4x128xf32>
    %cst_45 = arith.constant 1.66666663 : f32
    %134 = vector.broadcast %cst_45 : f32 to vector<4x128xf32>
    %135 = arith.subf %134, %0 : vector<4x128xf32>
    %cst_46 = arith.constant 1.500000e+00 : f32
    %136 = vector.broadcast %cst_46 : f32 to vector<4x128xf32>
    %137 = arith.mulf %135, %136 : vector<4x128xf32>
    %138 = arith.mulf %137, %59 : vector<4x128xf32>
    %139 = arith.addf %133, %138 : vector<4x128xf32>
    %cst_47 = arith.constant 1.000000e+00 : f32
    %140 = vector.broadcast %cst_47 : f32 to vector<4x128xf32>
    %141 = arith.subf %0, %140 : vector<4x128xf32>
    %cst_48 = arith.constant 1.500000e+00 : f32
    %142 = vector.broadcast %cst_48 : f32 to vector<4x128xf32>
    %143 = arith.mulf %141, %142 : vector<4x128xf32>
    %144 = arith.mulf %143, %59 : vector<4x128xf32>
    %cst_49 = arith.constant 2.33333325 : f32
    %145 = vector.broadcast %cst_49 : f32 to vector<4x128xf32>
    %146 = arith.subf %145, %0 : vector<4x128xf32>
    %cst_50 = arith.constant 1.500000e+00 : f32
    %147 = vector.broadcast %cst_50 : f32 to vector<4x128xf32>
    %148 = arith.mulf %146, %147 : vector<4x128xf32>
    %149 = arith.mulf %148, %66 : vector<4x128xf32>
    %150 = arith.addf %144, %149 : vector<4x128xf32>
    %cst_51 = arith.constant 1.66666663 : f32
    %151 = vector.broadcast %cst_51 : f32 to vector<4x128xf32>
    %152 = arith.subf %0, %151 : vector<4x128xf32>
    %cst_52 = arith.constant 1.500000e+00 : f32
    %153 = vector.broadcast %cst_52 : f32 to vector<4x128xf32>
    %154 = arith.mulf %152, %153 : vector<4x128xf32>
    %155 = arith.mulf %154, %66 : vector<4x128xf32>
    %cst_53 = arith.constant 3.000000e+00 : f32
    %156 = vector.broadcast %cst_53 : f32 to vector<4x128xf32>
    %157 = arith.subf %156, %0 : vector<4x128xf32>
    %cst_54 = arith.constant 1.500000e+00 : f32
    %158 = vector.broadcast %cst_54 : f32 to vector<4x128xf32>
    %159 = arith.mulf %157, %158 : vector<4x128xf32>
    %160 = arith.mulf %159, %73 : vector<4x128xf32>
    %161 = arith.addf %155, %160 : vector<4x128xf32>
    %cst_55 = arith.constant -3.000000e+00 : f32
    %162 = vector.broadcast %cst_55 : f32 to vector<4x128xf32>
    %163 = arith.subf %0, %162 : vector<4x128xf32>
    %cst_56 = arith.constant 7.500000e-01 : f32
    %164 = vector.broadcast %cst_56 : f32 to vector<4x128xf32>
    %165 = arith.mulf %163, %164 : vector<4x128xf32>
    %166 = arith.mulf %165, %84 : vector<4x128xf32>
    %cst_57 = arith.constant -1.000000e+00 : f32
    %167 = vector.broadcast %cst_57 : f32 to vector<4x128xf32>
    %168 = arith.subf %167, %0 : vector<4x128xf32>
    %cst_58 = arith.constant 7.500000e-01 : f32
    %169 = vector.broadcast %cst_58 : f32 to vector<4x128xf32>
    %170 = arith.mulf %168, %169 : vector<4x128xf32>
    %171 = arith.mulf %170, %95 : vector<4x128xf32>
    %172 = arith.addf %166, %171 : vector<4x128xf32>
    %cst_59 = arith.constant -2.33333325 : f32
    %173 = vector.broadcast %cst_59 : f32 to vector<4x128xf32>
    %174 = arith.subf %0, %173 : vector<4x128xf32>
    %cst_60 = arith.constant 7.500000e-01 : f32
    %175 = vector.broadcast %cst_60 : f32 to vector<4x128xf32>
    %176 = arith.mulf %174, %175 : vector<4x128xf32>
    %177 = arith.mulf %176, %95 : vector<4x128xf32>
    %cst_61 = arith.constant -0.333333343 : f32
    %178 = vector.broadcast %cst_61 : f32 to vector<4x128xf32>
    %179 = arith.subf %178, %0 : vector<4x128xf32>
    %cst_62 = arith.constant 7.500000e-01 : f32
    %180 = vector.broadcast %cst_62 : f32 to vector<4x128xf32>
    %181 = arith.mulf %179, %180 : vector<4x128xf32>
    %182 = arith.mulf %181, %106 : vector<4x128xf32>
    %183 = arith.addf %177, %182 : vector<4x128xf32>
    %cst_63 = arith.constant -1.66666663 : f32
    %184 = vector.broadcast %cst_63 : f32 to vector<4x128xf32>
    %185 = arith.subf %0, %184 : vector<4x128xf32>
    %cst_64 = arith.constant 7.500000e-01 : f32
    %186 = vector.broadcast %cst_64 : f32 to vector<4x128xf32>
    %187 = arith.mulf %185, %186 : vector<4x128xf32>
    %188 = arith.mulf %187, %106 : vector<4x128xf32>
    %cst_65 = arith.constant 0.333333343 : f32
    %189 = vector.broadcast %cst_65 : f32 to vector<4x128xf32>
    %190 = arith.subf %189, %0 : vector<4x128xf32>
    %cst_66 = arith.constant 7.500000e-01 : f32
    %191 = vector.broadcast %cst_66 : f32 to vector<4x128xf32>
    %192 = arith.mulf %190, %191 : vector<4x128xf32>
    %193 = arith.mulf %192, %117 : vector<4x128xf32>
    %194 = arith.addf %188, %193 : vector<4x128xf32>
    %cst_67 = arith.constant -1.000000e+00 : f32
    %195 = vector.broadcast %cst_67 : f32 to vector<4x128xf32>
    %196 = arith.subf %0, %195 : vector<4x128xf32>
    %cst_68 = arith.constant 7.500000e-01 : f32
    %197 = vector.broadcast %cst_68 : f32 to vector<4x128xf32>
    %198 = arith.mulf %196, %197 : vector<4x128xf32>
    %199 = arith.mulf %198, %117 : vector<4x128xf32>
    %cst_69 = arith.constant 1.000000e+00 : f32
    %200 = vector.broadcast %cst_69 : f32 to vector<4x128xf32>
    %201 = arith.subf %200, %0 : vector<4x128xf32>
    %cst_70 = arith.constant 7.500000e-01 : f32
    %202 = vector.broadcast %cst_70 : f32 to vector<4x128xf32>
    %203 = arith.mulf %201, %202 : vector<4x128xf32>
    %204 = arith.mulf %203, %128 : vector<4x128xf32>
    %205 = arith.addf %199, %204 : vector<4x128xf32>
    %cst_71 = arith.constant -0.333333343 : f32
    %206 = vector.broadcast %cst_71 : f32 to vector<4x128xf32>
    %207 = arith.subf %0, %206 : vector<4x128xf32>
    %cst_72 = arith.constant 7.500000e-01 : f32
    %208 = vector.broadcast %cst_72 : f32 to vector<4x128xf32>
    %209 = arith.mulf %207, %208 : vector<4x128xf32>
    %210 = arith.mulf %209, %128 : vector<4x128xf32>
    %cst_73 = arith.constant 1.66666663 : f32
    %211 = vector.broadcast %cst_73 : f32 to vector<4x128xf32>
    %212 = arith.subf %211, %0 : vector<4x128xf32>
    %cst_74 = arith.constant 7.500000e-01 : f32
    %213 = vector.broadcast %cst_74 : f32 to vector<4x128xf32>
    %214 = arith.mulf %212, %213 : vector<4x128xf32>
    %215 = arith.mulf %214, %139 : vector<4x128xf32>
    %216 = arith.addf %210, %215 : vector<4x128xf32>
    %cst_75 = arith.constant 0.333333343 : f32
    %217 = vector.broadcast %cst_75 : f32 to vector<4x128xf32>
    %218 = arith.subf %0, %217 : vector<4x128xf32>
    %cst_76 = arith.constant 7.500000e-01 : f32
    %219 = vector.broadcast %cst_76 : f32 to vector<4x128xf32>
    %220 = arith.mulf %218, %219 : vector<4x128xf32>
    %221 = arith.mulf %220, %139 : vector<4x128xf32>
    %cst_77 = arith.constant 2.33333325 : f32
    %222 = vector.broadcast %cst_77 : f32 to vector<4x128xf32>
    %223 = arith.subf %222, %0 : vector<4x128xf32>
    %cst_78 = arith.constant 7.500000e-01 : f32
    %224 = vector.broadcast %cst_78 : f32 to vector<4x128xf32>
    %225 = arith.mulf %223, %224 : vector<4x128xf32>
    %226 = arith.mulf %225, %150 : vector<4x128xf32>
    %227 = arith.addf %221, %226 : vector<4x128xf32>
    %cst_79 = arith.constant 1.000000e+00 : f32
    %228 = vector.broadcast %cst_79 : f32 to vector<4x128xf32>
    %229 = arith.subf %0, %228 : vector<4x128xf32>
    %cst_80 = arith.constant 7.500000e-01 : f32
    %230 = vector.broadcast %cst_80 : f32 to vector<4x128xf32>
    %231 = arith.mulf %229, %230 : vector<4x128xf32>
    %232 = arith.mulf %231, %150 : vector<4x128xf32>
    %cst_81 = arith.constant 3.000000e+00 : f32
    %233 = vector.broadcast %cst_81 : f32 to vector<4x128xf32>
    %234 = arith.subf %233, %0 : vector<4x128xf32>
    %cst_82 = arith.constant 7.500000e-01 : f32
    %235 = vector.broadcast %cst_82 : f32 to vector<4x128xf32>
    %236 = arith.mulf %234, %235 : vector<4x128xf32>
    %237 = arith.mulf %236, %161 : vector<4x128xf32>
    %238 = arith.addf %232, %237 : vector<4x128xf32>
    %cst_83 = arith.constant -3.000000e+00 : f32
    %239 = vector.broadcast %cst_83 : f32 to vector<4x128xf32>
    %240 = arith.subf %0, %239 : vector<4x128xf32>
    %cst_84 = arith.constant 5.000000e-01 : f32
    %241 = vector.broadcast %cst_84 : f32 to vector<4x128xf32>
    %242 = arith.mulf %240, %241 : vector<4x128xf32>
    %243 = arith.mulf %242, %172 : vector<4x128xf32>
    %cst_85 = arith.constant -0.333333343 : f32
    %244 = vector.broadcast %cst_85 : f32 to vector<4x128xf32>
    %245 = arith.subf %244, %0 : vector<4x128xf32>
    %cst_86 = arith.constant 5.000000e-01 : f32
    %246 = vector.broadcast %cst_86 : f32 to vector<4x128xf32>
    %247 = arith.mulf %245, %246 : vector<4x128xf32>
    %248 = arith.mulf %247, %183 : vector<4x128xf32>
    %249 = arith.addf %243, %248 : vector<4x128xf32>
    %cst_87 = arith.constant -2.33333325 : f32
    %250 = vector.broadcast %cst_87 : f32 to vector<4x128xf32>
    %251 = arith.subf %0, %250 : vector<4x128xf32>
    %cst_88 = arith.constant 5.000000e-01 : f32
    %252 = vector.broadcast %cst_88 : f32 to vector<4x128xf32>
    %253 = arith.mulf %251, %252 : vector<4x128xf32>
    %254 = arith.mulf %253, %183 : vector<4x128xf32>
    %cst_89 = arith.constant 0.333333343 : f32
    %255 = vector.broadcast %cst_89 : f32 to vector<4x128xf32>
    %256 = arith.subf %255, %0 : vector<4x128xf32>
    %cst_90 = arith.constant 5.000000e-01 : f32
    %257 = vector.broadcast %cst_90 : f32 to vector<4x128xf32>
    %258 = arith.mulf %256, %257 : vector<4x128xf32>
    %259 = arith.mulf %258, %194 : vector<4x128xf32>
    %260 = arith.addf %254, %259 : vector<4x128xf32>
    %cst_91 = arith.constant -1.66666663 : f32
    %261 = vector.broadcast %cst_91 : f32 to vector<4x128xf32>
    %262 = arith.subf %0, %261 : vector<4x128xf32>
    %cst_92 = arith.constant 5.000000e-01 : f32
    %263 = vector.broadcast %cst_92 : f32 to vector<4x128xf32>
    %264 = arith.mulf %262, %263 : vector<4x128xf32>
    %265 = arith.mulf %264, %194 : vector<4x128xf32>
    %cst_93 = arith.constant 1.000000e+00 : f32
    %266 = vector.broadcast %cst_93 : f32 to vector<4x128xf32>
    %267 = arith.subf %266, %0 : vector<4x128xf32>
    %cst_94 = arith.constant 5.000000e-01 : f32
    %268 = vector.broadcast %cst_94 : f32 to vector<4x128xf32>
    %269 = arith.mulf %267, %268 : vector<4x128xf32>
    %270 = arith.mulf %269, %205 : vector<4x128xf32>
    %271 = arith.addf %265, %270 : vector<4x128xf32>
    %cst_95 = arith.constant -1.000000e+00 : f32
    %272 = vector.broadcast %cst_95 : f32 to vector<4x128xf32>
    %273 = arith.subf %0, %272 : vector<4x128xf32>
    %cst_96 = arith.constant 5.000000e-01 : f32
    %274 = vector.broadcast %cst_96 : f32 to vector<4x128xf32>
    %275 = arith.mulf %273, %274 : vector<4x128xf32>
    %276 = arith.mulf %275, %205 : vector<4x128xf32>
    %cst_97 = arith.constant 1.66666663 : f32
    %277 = vector.broadcast %cst_97 : f32 to vector<4x128xf32>
    %278 = arith.subf %277, %0 : vector<4x128xf32>
    %cst_98 = arith.constant 5.000000e-01 : f32
    %279 = vector.broadcast %cst_98 : f32 to vector<4x128xf32>
    %280 = arith.mulf %278, %279 : vector<4x128xf32>
    %281 = arith.mulf %280, %216 : vector<4x128xf32>
    %282 = arith.addf %276, %281 : vector<4x128xf32>
    %cst_99 = arith.constant -0.333333343 : f32
    %283 = vector.broadcast %cst_99 : f32 to vector<4x128xf32>
    %284 = arith.subf %0, %283 : vector<4x128xf32>
    %cst_100 = arith.constant 5.000000e-01 : f32
    %285 = vector.broadcast %cst_100 : f32 to vector<4x128xf32>
    %286 = arith.mulf %284, %285 : vector<4x128xf32>
    %287 = arith.mulf %286, %216 : vector<4x128xf32>
    %cst_101 = arith.constant 2.33333325 : f32
    %288 = vector.broadcast %cst_101 : f32 to vector<4x128xf32>
    %289 = arith.subf %288, %0 : vector<4x128xf32>
    %cst_102 = arith.constant 5.000000e-01 : f32
    %290 = vector.broadcast %cst_102 : f32 to vector<4x128xf32>
    %291 = arith.mulf %289, %290 : vector<4x128xf32>
    %292 = arith.mulf %291, %227 : vector<4x128xf32>
    %293 = arith.addf %287, %292 : vector<4x128xf32>
    %cst_103 = arith.constant 0.333333343 : f32
    %294 = vector.broadcast %cst_103 : f32 to vector<4x128xf32>
    %295 = arith.subf %0, %294 : vector<4x128xf32>
    %cst_104 = arith.constant 5.000000e-01 : f32
    %296 = vector.broadcast %cst_104 : f32 to vector<4x128xf32>
    %297 = arith.mulf %295, %296 : vector<4x128xf32>
    %298 = arith.mulf %297, %227 : vector<4x128xf32>
    %cst_105 = arith.constant 3.000000e+00 : f32
    %299 = vector.broadcast %cst_105 : f32 to vector<4x128xf32>
    %300 = arith.subf %299, %0 : vector<4x128xf32>
    %cst_106 = arith.constant 5.000000e-01 : f32
    %301 = vector.broadcast %cst_106 : f32 to vector<4x128xf32>
    %302 = arith.mulf %300, %301 : vector<4x128xf32>
    %303 = arith.mulf %302, %238 : vector<4x128xf32>
    %304 = arith.addf %298, %303 : vector<4x128xf32>
    %c0_107 = arith.constant 0 : index
    %c0_108 = arith.constant 0 : index
    %c0_109 = arith.constant 0 : index
    %305 = vector.load %arg2[%c0_107, %c0_108, %c0_109] : memref<6x16x4xbf16, #tpu.memory_space<vmem>>, vector<1x16x4xbf16>
    %306 = vector.shape_cast %305 : vector<1x16x4xbf16> to vector<16x4xbf16>
    %307 = arith.truncf %249 : vector<4x128xf32> to vector<4x128xbf16>
    %cst_110 = arith.constant dense<0.000000e+00> : vector<16x128xf32>
    %308 = tpu.matmul %306, %307, %cst_110 {dimension_numbers = #tpu.dot_dimension_numbers<[1], [0], [0], [1], [0, 0, 1, 1], [], []>} : vector<16x4xbf16>, vector<4x128xbf16>, vector<16x128xf32> -> vector<16x128xf32>
    %309 = arith.addf %10, %308 : vector<16x128xf32>
    %c1 = arith.constant 1 : index
    %c0_111 = arith.constant 0 : index
    %c0_112 = arith.constant 0 : index
    %310 = vector.load %arg2[%c1, %c0_111, %c0_112] : memref<6x16x4xbf16, #tpu.memory_space<vmem>>, vector<1x16x4xbf16>
    %311 = vector.shape_cast %310 : vector<1x16x4xbf16> to vector<16x4xbf16>
    %312 = arith.truncf %260 : vector<4x128xf32> to vector<4x128xbf16>
    %cst_113 = arith.constant dense<0.000000e+00> : vector<16x128xf32>
    %313 = tpu.matmul %311, %312, %cst_113 {dimension_numbers = #tpu.dot_dimension_numbers<[1], [0], [0], [1], [0, 0, 1, 1], [], []>} : vector<16x4xbf16>, vector<4x128xbf16>, vector<16x128xf32> -> vector<16x128xf32>
    %314 = arith.addf %309, %313 : vector<16x128xf32>
    %c2 = arith.constant 2 : index
    %c0_114 = arith.constant 0 : index
    %c0_115 = arith.constant 0 : index
    %315 = vector.load %arg2[%c2, %c0_114, %c0_115] : memref<6x16x4xbf16, #tpu.memory_space<vmem>>, vector<1x16x4xbf16>
    %316 = vector.shape_cast %315 : vector<1x16x4xbf16> to vector<16x4xbf16>
    %317 = arith.truncf %271 : vector<4x128xf32> to vector<4x128xbf16>
    %cst_116 = arith.constant dense<0.000000e+00> : vector<16x128xf32>
    %318 = tpu.matmul %316, %317, %cst_116 {dimension_numbers = #tpu.dot_dimension_numbers<[1], [0], [0], [1], [0, 0, 1, 1], [], []>} : vector<16x4xbf16>, vector<4x128xbf16>, vector<16x128xf32> -> vector<16x128xf32>
    %319 = arith.addf %314, %318 : vector<16x128xf32>
    %c3 = arith.constant 3 : index
    %c0_117 = arith.constant 0 : index
    %c0_118 = arith.constant 0 : index
    %320 = vector.load %arg2[%c3, %c0_117, %c0_118] : memref<6x16x4xbf16, #tpu.memory_space<vmem>>, vector<1x16x4xbf16>
    %321 = vector.shape_cast %320 : vector<1x16x4xbf16> to vector<16x4xbf16>
    %322 = arith.truncf %282 : vector<4x128xf32> to vector<4x128xbf16>
    %cst_119 = arith.constant dense<0.000000e+00> : vector<16x128xf32>
    %323 = tpu.matmul %321, %322, %cst_119 {dimension_numbers = #tpu.dot_dimension_numbers<[1], [0], [0], [1], [0, 0, 1, 1], [], []>} : vector<16x4xbf16>, vector<4x128xbf16>, vector<16x128xf32> -> vector<16x128xf32>
    %324 = arith.addf %319, %323 : vector<16x128xf32>
    %c4 = arith.constant 4 : index
    %c0_120 = arith.constant 0 : index
    %c0_121 = arith.constant 0 : index
    %325 = vector.load %arg2[%c4, %c0_120, %c0_121] : memref<6x16x4xbf16, #tpu.memory_space<vmem>>, vector<1x16x4xbf16>
    %326 = vector.shape_cast %325 : vector<1x16x4xbf16> to vector<16x4xbf16>
    %327 = arith.truncf %293 : vector<4x128xf32> to vector<4x128xbf16>
    %cst_122 = arith.constant dense<0.000000e+00> : vector<16x128xf32>
    %328 = tpu.matmul %326, %327, %cst_122 {dimension_numbers = #tpu.dot_dimension_numbers<[1], [0], [0], [1], [0, 0, 1, 1], [], []>} : vector<16x4xbf16>, vector<4x128xbf16>, vector<16x128xf32> -> vector<16x128xf32>
    %329 = arith.addf %324, %328 : vector<16x128xf32>
    %c5 = arith.constant 5 : index
    %c0_123 = arith.constant 0 : index
    %c0_124 = arith.constant 0 : index
    %330 = vector.load %arg2[%c5, %c0_123, %c0_124] : memref<6x16x4xbf16, #tpu.memory_space<vmem>>, vector<1x16x4xbf16>
    %331 = vector.shape_cast %330 : vector<1x16x4xbf16> to vector<16x4xbf16>
    %332 = arith.truncf %304 : vector<4x128xf32> to vector<4x128xbf16>
    %cst_125 = arith.constant dense<0.000000e+00> : vector<16x128xf32>
    %333 = tpu.matmul %331, %332, %cst_125 {dimension_numbers = #tpu.dot_dimension_numbers<[1], [0], [0], [1], [0, 0, 1, 1], [], []>} : vector<16x4xbf16>, vector<4x128xbf16>, vector<16x128xf32> -> vector<16x128xf32>
    %334 = arith.addf %329, %333 : vector<16x128xf32>
    %c0_126 = arith.constant 0 : index
    %c0_127 = arith.constant 0 : index
    %335 = vector.load %arg4[%c0_126, %c0_127] : memref<16x128xf32, #tpu.memory_space<vmem>>, vector<16x128xf32>
    tpu.vector_store %arg4[%c0_126, %c0_127], %334 {strides = array<i32>} : memref<16x128xf32, #tpu.memory_space<vmem>>, vector<16x128xf32>,
    return
  }
  func.func @transform_0(%arg0: i32) -> (i32, i32) {
    %c0_i32 = arith.constant 0 : i32
    %c0_i32_0 = arith.constant 0 : i32
    return %c0_i32, %arg0 : i32, i32
  }
  func.func @transform_1(%arg0: i32) -> (i32, i32, i32) {
    %c0_i32 = arith.constant 0 : i32
    %c0_i32_0 = arith.constant 0 : i32
    %c0_i32_1 = arith.constant 0 : i32
    %c0_i32_2 = arith.constant 0 : i32
    return %c0_i32, %c0_i32_0, %c0_i32_1 : i32, i32, i32
  }
  func.func @transform_2(%arg0: i32) -> (i32, i32) {
    %c0_i32 = arith.constant 0 : i32
    %c0_i32_0 = arith.constant 0 : i32
    %c0_i32_1 = arith.constant 0 : i32
    return %c0_i32, %c0_i32_0 : i32, i32
  }
  func.func @transform_3(%arg0: i32) -> (i32, i32) {
    %c0_i32 = arith.constant 0 : i32
    %c0_i32_0 = arith.constant 0 : i32
    return %c0_i32, %arg0 : i32, i32
  }
}

</mosaic_0001>

<bundles_post_ra>
// kernel: tpu_custom_call.1
= control target key start
LH: loop header
LB: loop body
LE: loop exit
PB: predicated region body
PF: predicated region fallthrough
CT: control target
= control target key end

     0   :  { %v525_v2 = vmov 0.0   ;;  %s656_s0 = inlined_call_operand.vmem [shape: f32[4,128], index: 0, kind: input, shape index: {}]   ;;  %s657_s1 = inlined_call_operand.vmem [shape: bf16[6,16,4], index: 1, kind: input, shape index: {}]   ;;  %s658_s2 = inlined_call_operand.vmem [shape: bf16[16,4], index: 2, kind: input, shape index: {}]   ;;  %s659_s3 = inlined_call_operand.hbm [shape: f32[16,128], index: 3, kind: output, shape index: {}]  }
   0x1   :  { %v552_v0 = vld [vmem:[%s656_s0] sm:$0xf] }
   0x2   :  { %vm26_vm0 = vcmp.ge.f32.partialorder %v552_v0, -3.0  ;;  %vm27_vm1 = vcmp.lt.f32.partialorder %v552_v0, -2.3333333  ;;  %vm31_vm2 = vcmp.ge.f32.partialorder %v552_v0, -2.3333333  ;;  %vm37_vm3 = vcmp.lt.f32.partialorder %v552_v0, -1.0 }
   0x3   :  { %vm28_vm4 = vmand %vm26_vm0, %vm27_vm1  ;;  %vm32_vm5 = vcmp.lt.f32.partialorder %v552_v0, -1.6666666  ;;  %vm36_vm6 = vcmp.ge.f32.partialorder %v552_v0, -1.6666666  ;;  %vm41_vm7 = vcmp.ge.f32.partialorder %v552_v0, -1.0  ;;  %v431_v1 = vadd.f32 3.0, %v552_v0 }
   0x4   :  { %v422_v3 = vsel %vm28_vm4, 1.0, %v525_v2  ;;  %vm33_vm8 = vmand %vm31_vm2, %vm32_vm5  ;;  %vm42_vm9 = vcmp.lt.f32.partialorder %v552_v0, -0.33333334  ;;  %v74_v4 = vsub.f32 -1.6666666, %v552_v0  ;;  %v81_v5 = vsub.f32 -1.0, %v552_v0 }
   0x5   :  { %v423_v6 = vsel %vm33_vm8, 1.0, %v525_v2  ;;  %vm38_vm10 = vmand %vm36_vm6, %vm37_vm3  ;;  %v72_v7 = vmul.f32 1.5, %v431_v1  ;;  %v432_v8 = vadd.f32 2.3333333, %v552_v0  ;;  %v569_v9 = vadd.f32 1.6666666, %v552_v0 }
   0x6   :  { %v424_v10 = vsel %vm38_vm10, 1.0, %v525_v2  ;;  %vm43_vm11 = vmand %vm41_vm7, %vm42_vm9  ;;  %v75_v11 = vmul.f32 1.5, %v74_v4  ;;  %v82_v12 = vmul.f32 1.5, %v81_v5  ;;  %v88_v13 = vsub.f32 -0.33333334, %v552_v0 }
   0x7   :  { %v425_v14 = vsel %vm43_vm11, 1.0, %v525_v2  ;;  %v73_v15 = vmul.f32 %v422_v3, %v72_v7  ;;  %v79_v16 = vmul.f32 1.5, %v432_v8  ;;  %v86_v17 = vmul.f32 1.5, %v569_v9 }
   0x8   :  { %8 = vsyncpa [#allocation3], 0  ;;  %v76_v18 = vmul.f32 %v423_v6, %v75_v11  ;;  %v83_v19 = vmul.f32 %v424_v10, %v82_v12  ;;  %v89_v20 = vmul.f32 1.5, %v88_v13  ;;  %v127_v21 = vmul.f32 0.75, %v431_v1  ;;  %v485_v12 = vld [vmem:[%s657_s1] sm:$0xff]  ;;  %s410_s29 = sshll.u32 %s659_s3, 4  ;;  %s411_s29 = int_to_ptr.hbm [resolvable:$true] %s410_s29 }
   0x9   :  { %v80_v22 = vmul.f32 %v423_v6, %v79_v16  ;;  %v87_v23 = vmul.f32 %v424_v10, %v86_v17  ;;  %v129_v24 = vmul.f32 0.75, %v81_v5  ;;  %v132_v25 = vmul.f32 0.75, %v432_v8  ;;  %s527_s30 = smov 128   ;;  %s528_s4 = smov 8  }
   0xa   :  { %v77_v26 = vadd.f32 %v76_v18, %v73_v15  ;;  %v90_v27 = vmul.f32 %v425_v14, %v89_v20  ;;  %v134_v28 = vmul.f32 0.75, %v88_v13  ;;  %v162_v29 = vmul.f32 0.5, %v431_v1 }
   0xb   :  { %v84_v30 = vadd.f32 %v83_v19, %v80_v22  ;;  %v164_v31 = vmul.f32 0.5, %v88_v13  ;;  %vm46_vm12 = vcmp.ge.f32.partialorder %v552_v0, -0.33333334  ;;  %vm47_vm13 = vcmp.lt.f32.partialorder %v552_v0, 0.33333334 }
   0xc   :  { %v91_v32 = vadd.f32 %v90_v27, %v87_v23  ;;  %v128_v33 = vmul.f32 %v127_v21, %v77_v26  ;;  %vm48_vm14 = vmand %vm46_vm12, %vm47_vm13  ;;  %v578_v34 = vadd.f32 1.0, %v552_v0  ;;  %v95_v35 = vsub.f32 0.33333334, %v552_v0 }
   0xd   :  { %v130_v36 = vmul.f32 %v129_v24, %v84_v30  ;;  %v133_v37 = vmul.f32 %v132_v25, %v84_v30  ;;  %vm204_vm15 = vcmask 1041408   ;;  %v426_v38 = vsel %vm48_vm14, 1.0, %v525_v2 }
   0xe   :  { %v137_v39 = vmul.f32 0.75, %v569_v9  ;;  %v135_v40 = vmul.f32 %v134_v28, %v91_v32  ;;  %v93_v41 = vmul.f32 1.5, %v578_v34  ;;  %v96_v42 = vmul.f32 1.5, %v95_v35 }
   0xf   :  { %v139_v43 = vmul.f32 0.75, %v95_v35  ;;  %v131_v44 = vadd.f32 %v130_v36, %v128_v33  ;;  %v167_v46 = vmul.f32 0.5, %v432_v8  ;;  %v169_v47 = vmul.f32 0.5, %v95_v35  ;;  %v486_v36 = vld [vmem:[%s657_s1 + $0x8] sm:$0xff] }
  0x10   :  { %v138_v45 = vmul.f32 %v137_v39, %v91_v32  ;;  %v136_v48 = vadd.f32 %v135_v40, %v133_v37  ;;  %v94_v49 = vmul.f32 %v425_v14, %v93_v41  ;;  %v97_v50 = vmul.f32 %v426_v38, %v96_v42 }
  0x11   :  { %vm51_vm0 = vcmp.ge.f32.partialorder %v552_v0, 0.33333334  ;;  %v163_v51 = vmul.f32 %v162_v29, %v131_v44  ;;  %vm200_vm1 = vcmask 31744   ;;  %vm52_vm2 = vcmp.le.f32.partialorder %v552_v0, 1.0 }
  0x12   :  { %v587_v52 = vadd.f32 0.33333334, %v552_v0  ;;  %v102_v53 = vsub.f32 1.0, %v552_v0  ;;  %v165_v54 = vmul.f32 %v164_v31, %v136_v48  ;;  %v98_v55 = vadd.f32 %v97_v50, %v94_v49  ;;  %vm53_vm3 = vmand %vm51_vm0, %vm52_vm2 }
  0x13   :  { %v168_v56 = vmul.f32 %v167_v46, %v136_v48  ;;  %v142_v57 = vmul.f32 0.75, %v578_v34  ;;  %v427_v58 = vsel %vm53_vm3, 1.0, %v525_v2  ;;  %v172_v3 = vmul.f32 0.5, %v569_v9 }
  0x14   :  { %v100_v59 = vmul.f32 1.5, %v587_v52  ;;  %v103_v60 = vmul.f32 1.5, %v102_v53  ;;  %v144_v61 = vmul.f32 0.75, %v102_v53  ;;  %v166_v62 = vadd.f32 %v165_v54, %v163_v51 }
  0x15   :  { %v140_v63 = vmul.f32 %v139_v43, %v98_v55  ;;  %v143_v1 = vmul.f32 %v142_v57, %v98_v55  ;;  %v174_v6 = vmul.f32 0.5, %v102_v53  ;;  %vm56_vm4 = vcmp.ge.f32.partialorder %v552_v0, 1.0 }
  0x16   :  { %v101_v4 = vmul.f32 %v426_v38, %v100_v59  ;;  %v104_v5 = vmul.f32 %v427_v58, %v103_v60  ;;  %v194_v7 = vpack.c.bf16 %v166_v62, %v166_v62  ;;  %vm57_vm5 = vcmp.lt.f32.partialorder %v552_v0, 1.6666666 }
  0x17   :  { %v141_v8 = vadd.f32 %v140_v63, %v138_v45  ;;  %vm61_vm6 = vcmp.ge.f32.partialorder %v552_v0, 1.6666666  ;;  %vm58_vm7 = vmand %vm56_vm4, %vm57_vm5  ;;  %vm62_vm8 = vcmp.lt.f32.partialorder %v552_v0, 2.3333333  ;;  %vm66_vm9 = vcmp.ge.f32.partialorder %v552_v0, 2.3333333 }
  0x18   :  { %v597_v10 = vadd.f32 %v104_v5, %v101_v4  ;;  %vm67_vm10 = vcmp.lt.f32.partialorder %v552_v0, 3.0  ;;  %v206_v9 = vsel %vm204_vm15, %v194_v7, 0  ;;  %v428_v14 = vsel %vm58_vm7, 1.0, %v525_v2  ;;  %vm63_vm11 = vmand %vm61_vm6, %vm62_vm8 }
  0x19   :  { %v170_v11 = vmul.f32 %v169_v47, %v141_v8  ;;  %v173_v13 = vmul.f32 %v172_v3, %v141_v8  ;;  %215 = vmatpush.bf16.msra.mxu0 %v206_v9  ;;  %v429_v16 = vsel %vm63_vm11, 1.0, %v525_v2  ;;  %vm68_vm12 = vmand %vm66_vm9, %vm67_vm10  ;;  %v436_v17 = vadd.f32 -0.33333334, %v552_v0 }
  0x1a   :  { %v145_v15 = vmul.f32 %v144_v61, %v597_v10  ;;  %v109_v18 = vsub.f32 1.6666666, %v552_v0  ;;  %v430_v20 = vsel %vm68_vm12, 1.0, %v525_v2  ;;  %v437_v21 = vadd.f32 -1.0, %v552_v0 }
  0x1b   :  { %v171_v19 = vadd.f32 %v170_v11, %v168_v56  ;;  %v116_v22 = vsub.f32 2.3333333, %v552_v0  ;;  %v107_v24 = vmul.f32 1.5, %v436_v17  ;;  %v438_v26 = vadd.f32 -1.6666666, %v552_v0 }
  0x1c   :  { %v146_v23 = vadd.f32 %v145_v15, %v143_v1  ;;  %v110_v25 = vmul.f32 1.5, %v109_v18  ;;  %443 = vmatmul.msk.bf16.vlgmr.msra.gmra.mxu0 %vm200_vm1, %v485_v12  ;;  %v114_v28 = vmul.f32 1.5, %v437_v21  ;;  %v123_v30 = vsub.f32 3.0, %v552_v0 }
  0x1d   :  { %v250_v27 = vpack.c.bf16 %v171_v19, %v171_v19  ;;  %v117_v29 = vmul.f32 1.5, %v116_v22  ;;  %v108_v32 = vmul.f32 %v427_v58, %v107_v24  ;;  %v121_v2 = vmul.f32 1.5, %v438_v26  ;;  %v487_v58 = vld [vmem:[%s657_s1 + $0x10] sm:$0xff] }
  0x1e   :  { %v175_v31 = vmul.f32 %v174_v6, %v146_v23  ;;  %v111_v33 = vmul.f32 %v428_v14, %v110_v25  ;;  %v115_v37 = vmul.f32 %v428_v14, %v114_v28  ;;  %v124_v39 = vmul.f32 1.5, %v123_v30  ;;  %v490_v25 = vld [vmem:[%s657_s1 + $0x28] sm:$0xff] }
  0x1f   :  { %v260_v35 = vsel %vm204_vm15, %v250_v27, 0  ;;  %v118_v38 = vmul.f32 %v429_v16, %v117_v29  ;;  %v122_v42 = vmul.f32 %v429_v16, %v121_v2  ;;  %v152_v43 = vmul.f32 0.75, %v436_v17 }
  0x20   :  { %269 = vmatpush.bf16.msra.mxu2 %v260_v35  ;;  %v176_v40 = vadd.f32 %v175_v31, %v173_v13  ;;  %v112_v41 = vadd.f32 %v111_v33, %v108_v32  ;;  %v125_v45 = vmul.f32 %v430_v20, %v124_v39  ;;  %v154_v46 = vmul.f32 0.75, %v116_v22  ;;  %v484_v32 = vld [vmem:[%s658_s2] sm:$0xff] }
  0x21   :  { %v119_v44 = vadd.f32 %v118_v38, %v115_v37  ;;  %v157_v47 = vmul.f32 0.75, %v437_v21  ;;  %v159_v50 = vmul.f32 0.75, %v123_v30  ;;  %v187_v55 = vmul.f32 0.5, %v436_v17  ;;  %v489_v33 = vld [vmem:[%s657_s1 + $0x20] sm:$0xff] }
  0x22   :  { %v281_v48 = vpack.c.bf16 %v176_v40, %v176_v40  ;;  %v153_v49 = vmul.f32 %v152_v43, %v112_v41  ;;  %v126_v51 = vadd.f32 %v125_v45, %v122_v42  ;;  %v17_v57 = vsub.f32 0.0, %v552_v0 }
  0x23   :  { %455 = vmatmul.msk.bf16.vlgmr.msra.gmra.mxu2 %vm200_vm1, %v486_v36  ;;  %v155_v53 = vmul.f32 %v154_v46, %v119_v44  ;;  %v158_v54 = vmul.f32 %v157_v47, %v119_v44  ;;  %v147_v59 = vmul.f32 0.75, %v587_v52  ;;  %v149_v60 = vmul.f32 0.75, %v109_v18 }
  0x24   :  { %v291_v56 = vsel %vm204_vm15, %v281_v48, 0  ;;  %v160_v62 = vmul.f32 %v159_v50, %v126_v51  ;;  %v189_v63 = vmul.f32 0.5, %v123_v30  ;;  %v177_v1 = vmul.f32 0.5, %v578_v34 }
  0x25   :  { %300 = vmatpush.bf16.msra.mxu3 %v291_v56  ;;  %v156_v61 = vadd.f32 %v155_v53, %v153_v49  ;;  %v18_v3 = vmul.f32 1.442695, %v17_v57  ;;  %v148_v4 = vmul.f32 %v147_v59, %v597_v10  ;;  %v150_v5 = vmul.f32 %v149_v60, %v112_v41 }
  0x26   :  { %v179_v6 = vmul.f32 0.5, %v109_v18  ;;  %v161_v7 = vadd.f32 %v160_v62, %v158_v54  ;;  %v178_v11 = vmul.f32 %v177_v1, %v146_v23  ;;  %v182_v15 = vmul.f32 0.5, %v587_v52  ;;  %v488_v52 = vld [vmem:[%s657_s1 + $0x18] sm:$0xff]  ;;  %s526_s1 = smov [#allocation2]  }
  0x27   :  { %v188_v8 = vmul.f32 %v187_v55, %v156_v61  ;;  %495 = vpow2.f32 %v18_v3  ;;  %v151_v9 = vadd.f32 %v150_v5, %v148_v4  ;;  %v184_v16 = vmul.f32 0.5, %v116_v22  ;;  %s408_s2 = sshll.u32 %s526_s1, 4  ;;  %s409_s2 = int_to_ptr.vmem [resolvable:$true] %s408_s2 }
  0x28   :  { %462 = vmatmul.msk.bf16.vlgmr.msra.gmra.mxu3 %vm200_vm1, %v487_v58  ;;  %v190_v12 = vmul.f32 %v189_v63, %v161_v7 }
  0x29   :  { %v180_v13 = vmul.f32 %v179_v6, %v151_v9  ;;  %v183_v21 = vmul.f32 %v182_v15, %v151_v9  ;;  %v185_v24 = vmul.f32 %v184_v16, %v156_v61 }
  0x2a   :  { %v191_v14 = vadd.f32 %v190_v12, %v188_v8 }
  0x2b   :  { %v181_v17 = vadd.f32 %v180_v13, %v178_v11  ;;  %v186_v22 = vadd.f32 %v185_v24, %v183_v21 }
  0x2c   :  { %v374_v34 = vpack.c.bf16 %v191_v14, %v191_v14 }
  0x2d   :  { %v496_v19 = vpop.eup %495  ;;  %v312_v20 = vpack.c.bf16 %v181_v17, %v181_v17  ;;  %v343_v27 = vpack.c.bf16 %v186_v22, %v186_v22 }
  0x2e   :  { %v384_v10 = vsel %vm204_vm15, %v374_v34, 0  ;;  %v20_v18 = vadd.f32 1.0, %v496_v19 }
  0x2f   :  { %393 = vmatpush.bf16.msrb.mxu2 %v384_v10  ;;  %v322_v23 = vsel %vm204_vm15, %v312_v20, 0  ;;  %v353_v30 = vsel %vm204_vm15, %v343_v27, 0 }
  0x30   :  { %497 = vrcp.f32 %v20_v18  ;;  %331 = vmatpush.bf16.msrb.mxu0 %v322_v23 }
  0x33   :  { %483 = vmatmul.msk.bf16.vlgmr.msrb.gmra.mxu2 %vm200_vm1, %v490_v25  ;;  %469 = vmatmul.msk.bf16.vlgmr.msrb.gmra.mxu0 %vm200_vm1, %v488_v52 }
  0x36   :  { %v498_v26 = vpop.eup %497 }
  0x37   :  { %v22_v28 = vmul.f32 %v498_v26, %v552_v0 }
  0x39   :  { %v25_v29 = vpack.c.bf16 %v22_v28, %v22_v28 }
  0x3b   :  { %v231_v31 = vsel %vm204_vm15, %v25_v29, 0 }
  0x3c   :  { %240 = vmatpush.bf16.msra.mxu1 %v231_v31 }
  0x3f   :  { %448 = vmatmul.msk.bf16.vlgmr.msra.gmra.mxu1 %vm200_vm1, %v484_v32 }
  0x40   :  { %362 = vmatpush.bf16.msrb.mxu1 %v353_v30 }
  0x4f   :  { %476 = vmatmul.msk.bf16.vlgmr.msrb.gmra.mxu1 %vm200_vm1, %v489_v33 }
  0x99   :  { %v217_v0 = vpop.f32.mrf.mxu0 }
  0xa1   :  { %v219_v36 = vpop.f32.mrf.mxu0 }
  0xa6   :  { %v271_v2 = vpop.f32.mrf.mxu2 }
  0xab   :  { %v302_v39 = vpop.f32.mrf.mxu3 }
  0xae   :  { %v273_v38 = vpop.f32.mrf.mxu2 }
  0xb0   :  { %v333_v42 = vpop.f32.mrf.mxu0 }
  0xb3   :  { %v304_v50 = vpop.f32.mrf.mxu3 }
  0xb6   :  { %v395_v47 = vpop.f32.mrf.mxu2 }
  0xb8   :  { %v335_v53 = vpop.f32.mrf.mxu0 }
  0xbc   :  { %v242_v35 = vpop.f32.mrf.mxu1 }
  0xbd   :  { %v243_v37 = vadd.f32 %v242_v35, %v217_v0 }
  0xbe   :  { %v397_v58 = vpop.f32.mrf.mxu2 }
  0xbf   :  { %v276_v41 = vadd.f32 %v271_v2, %v243_v37 }
  0xc1   :  { %v307_v43 = vadd.f32 %v302_v39, %v276_v41 }
  0xc3   :  { %v338_v45 = vadd.f32 %v333_v42, %v307_v43 }
  0xc4   :  { %v244_v40 = vpop.f32.mrf.mxu1 }
  0xc5   :  { %v245_v44 = vadd.f32 %v244_v40, %v219_v36 }
  0xc7   :  { %v277_v48 = vadd.f32 %v273_v38, %v245_v44 }
  0xc9   :  { %v308_v54 = vadd.f32 %v304_v50, %v277_v48 }
  0xcb   :  { %v339_v55 = vadd.f32 %v335_v53, %v308_v54 }
  0xcc   :  { %v364_v46 = vpop.f32.mrf.mxu1 }
  0xcd   :  { %v369_v49 = vadd.f32 %v364_v46, %v338_v45 }
  0xcf   :  { %v400_v51 = vadd.f32 %v395_v47, %v369_v49 }
  0xd1   :  { %402 = vst [vmem:[#allocation2] sm:$0xff] %v400_v51 }
  0xd4   :  { %v366_v56 = vpop.f32.mrf.mxu1 }
  0xd5   :  { %v370_v57 = vadd.f32 %v366_v56, %v339_v55 }
  0xd7   :  { %v401_v59 = vadd.f32 %v397_v58, %v370_v57 }
  0xd9   :  { %403 = vst [vmem:[#allocation2 + $0x8] sm:$0xff] %v401_v59 }
  0xda   :  { %416 = dma.vmem_to_hbm [thread:$0]  %s409_s2, 256, %s411_s29, [#allocation3], %s527_s30, %s527_s30, %s528_s4  }
  0xdb   :  { %523 = dma.done.wait [#allocation3], 256  }
  0xdc   :  { %524 = vsyncadd [#allocation3], 4294967040 }
  0xdd   :  { %421 = vsyncpa [#allocation3], 1 }

</bundles_post_ra>
